<compile_context>
chip_gen: v6e
topology: v6e:2x2x1
jax: 0.10.0
libtpu: 0.0.40
codegen_flags: <defaults>
</compile_context>

<pallas_src>
import functools

import jax
import jax.numpy as jnp
from jax.experimental import pallas as pl
from jax.experimental.pallas import tpu as pltpu


def _mha_fused_kernel(x_ref, w_ref, b_ref, o_ref, *, n_heads, d_head):
    d = n_heads * d_head
    xb = x_ref[0]                                                    # [S, d]

    # Fused (already-scaled) Q / K / V projection: one wide MXU matmul.
    qkv = jnp.dot(xb, w_ref[...], preferred_element_type=jnp.float32) + b_ref[...]  # [S, 3d]

    q = qkv[:, 0 * d:1 * d]          # scale already folded into the fused weights/bias
    k = qkv[:, 1 * d:2 * d]
    v = qkv[:, 2 * d:3 * d]

    # Per-head attention; n_heads is small & static -> unrolls at trace time.
    outs = []
    for h in range(n_heads):
        lo = h * d_head
        qh = q[:, lo:lo + d_head]    # [S, d_head]
        kh = k[:, lo:lo + d_head]
        vh = v[:, lo:lo + d_head]

        s = jnp.dot(qh, kh.T, preferred_element_type=jnp.float32)   # [S, S]
        m = jnp.max(s, axis=-1, keepdims=True)                      # numerically-stable softmax
        e = jnp.exp(s - m)                                           # EUP
        inv_l = pl.reciprocal(jnp.sum(e, axis=-1, keepdims=True), approx=False)
        p = e * inv_l
        outs.append(jnp.dot(p, vh, preferred_element_type=jnp.float32))

    # Single lane-dense [S, d] store (heads concatenated along the feature axis).
    o_ref[0] = jnp.concatenate(outs, axis=-1).astype(o_ref.dtype)


def multi_head_attention(x, wq, bq, wk, bk, wv, bv, *, n_heads):
    """x: [B, S, d]; wq/wk/wv: [H, d_head, d_head]; bq/bk/bv: [H, d_head] -> [B, S, d]."""
    B, S, d = x.shape
    assert d % n_heads == 0
    d_head = d // n_heads
    H = n_heads
    scale = 1.0 / (float(d_head) ** 0.5)

    # Fuse the per-head nn.Linear layers into one block-diagonal, pre-transposed matrix:
    #   qkv = x @ W_fused + b_fused,   W_fused: [d, 3d]  (q | k | v column blocks,
    #   head-major inside each block).  The attention scale is baked into the q block.
    def _blockdiag_T(w):  # w: [H, d_head, d_head] (nn.Linear weight) -> [d, d]
        return jax.scipy.linalg.block_diag(*[w[h].T for h in range(H)])

    w_fused = jnp.concatenate(
        [_blockdiag_T(wq) * scale, _blockdiag_T(wk), _blockdiag_T(wv)], axis=1)   # [d, 3d]
    b_fused = jnp.concatenate(
        [bq.reshape(-1) * scale, bk.reshape(-1), bv.reshape(-1)]).reshape(1, 3 * d)  # [1, 3d]

    kernel = functools.partial(_mha_fused_kernel, n_heads=H, d_head=d_head)

    return pl.pallas_call(
        kernel,
        out_shape=jax.ShapeDtypeStruct((B, S, d), x.dtype),
        grid=(B,),
        in_specs=[
            pl.BlockSpec((1, S, d), lambda b: (b, 0, 0)),        # lane-dense x, no transpose
            pl.BlockSpec((d, 3 * d), lambda b: (0, 0)),          # fused weight, VMEM-resident
            pl.BlockSpec((1, 3 * d), lambda b: (0, 0)),          # fused bias,   VMEM-resident
        ],
        out_specs=pl.BlockSpec((1, S, d), lambda b: (b, 0, 0)),   # lane-dense [B, S, d] output
        compiler_params=pltpu.CompilerParams(
            dimension_semantics=("parallel",)),                   # shard batch across TCs (v7x)
    )(x, w_fused, b_fused)


def _reference(x, wq, bq, wk, bk, wv, bv, n_heads):
    """Pure-JAX reference mirroring the PyTorch loop semantics."""
    B, S, d = x.shape
    d_head = d // n_heads
    outs = []
    for b in range(B):
        heads = []
        for h in range(n_heads):
            seq = x[b, :, h * d_head:(h + 1) * d_head]
            q = seq @ wq[h].T + bq[h]
            k = seq @ wk[h].T + bk[h]
            v = seq @ wv[h].T + bv[h]
            s = q @ k.T / (d_head ** 0.5)
            a = jax.nn.softmax(s, axis=-1)
            heads.append(a @ v)
        outs.append(jnp.concatenate(heads, axis=-1))
    return jnp.stack(outs, axis=0)


if __name__ == "__main__":
    # small shapes consistent with the module: batch=2, seq=8, hidden d=32, n_heads=4 (d_head=8)
    B, S, d, n_heads = 2, 8, 32, 4
    d_head = d // n_heads

    key = jax.random.PRNGKey(0)
    kx, kwq, kbq, kwk, kbk, kwv, kbv = jax.random.split(key, 7)

    x = jax.random.normal(kx, (B, S, d), dtype=jnp.float32)

    # deterministic init mimicking nn.Linear default: U(-1/sqrt(fan_in), 1/sqrt(fan_in))
    bound = 1.0 / (d_head ** 0.5)
    wq = jax.random.uniform(kwq, (n_heads, d_head, d_head), minval=-bound, maxval=bound, dtype=jnp.float32)
    bq = jax.random.uniform(kbq, (n_heads, d_head), minval=-bound, maxval=bound, dtype=jnp.float32)
    wk = jax.random.uniform(kwk, (n_heads, d_head, d_head), minval=-bound, maxval=bound, dtype=jnp.float32)
    bk = jax.random.uniform(kbk, (n_heads, d_head), minval=-bound, maxval=bound, dtype=jnp.float32)
    wv = jax.random.uniform(kwv, (n_heads, d_head, d_head), minval=-bound, maxval=bound, dtype=jnp.float32)
    bv = jax.random.uniform(kbv, (n_heads, d_head), minval=-bound, maxval=bound, dtype=jnp.float32)

    out = multi_head_attention(x, wq, bq, wk, bk, wv, bv, n_heads=n_heads)
    out = jax.block_until_ready(out)

    ref = _reference(x, wq, bq, wk, bk, wv, bv, n_heads)
    assert out.shape == (B, S, d), out.shape
    assert jnp.allclose(out, ref, atol=1e-5, rtol=1e-5), float(jnp.max(jnp.abs(out - ref)))

    print("KERNEL_OK")
</pallas_src>

<mosaic_0001>
module attributes {stable_mosaic.version = 11 : i64} {
  func.func @_mha_fused_kernel(%arg0: i32, %arg1: memref<1x8x32xf32, #tpu.memory_space<vmem>>, %arg2: memref<32x96xf32, #tpu.memory_space<vmem>>, %arg3: memref<1x96xf32, #tpu.memory_space<vmem>>, %arg4: memref<1x8x32xf32, #tpu.memory_space<vmem>>) attributes {dimension_semantics = [#tpu.dimension_semantics<parallel>], iteration_bounds = array<i64: 2>, scalar_prefetch = 0 : i64, scratch_operands = 0 : i64, tpu.core_type = #tpu.core_type<tc>, window_params = [{transform_indices = @transform_0, window_bounds = array<i64: 1, 8, 32>}, {pipeline_mode = #tpu.pipeline_mode<synchronous>, transform_indices = @transform_1, window_bounds = array<i64: 32, 96>}, {pipeline_mode = #tpu.pipeline_mode<synchronous>, transform_indices = @transform_2, window_bounds = array<i64: 1, 96>}, {transform_indices = @transform_3, window_bounds = array<i64: 1, 8, 32>}]} {
    %c0 = arith.constant 0 : index
    %c0_0 = arith.constant 0 : index
    %c0_1 = arith.constant 0 : index
    %0 = vector.load %arg1[%c0, %c0_0, %c0_1] : memref<1x8x32xf32, #tpu.memory_space<vmem>>, vector<1x8x32xf32>
    %1 = vector.shape_cast %0 : vector<1x8x32xf32> to vector<8x32xf32>
    %c0_2 = arith.constant 0 : index
    %c0_3 = arith.constant 0 : index
    %2 = vector.load %arg2[%c0_2, %c0_3] : memref<32x96xf32, #tpu.memory_space<vmem>>, vector<32x96xf32>
    %cst = arith.constant dense<0.000000e+00> : vector<8x96xf32>
    %3 = tpu.matmul %1, %2, %cst {dimension_numbers = #tpu.dot_dimension_numbers<[1], [0], [0], [1], [0, 0, 1, 1], [], []>} : vector<8x32xf32>, vector<32x96xf32>, vector<8x96xf32> -> vector<8x96xf32>
    %c0_4 = arith.constant 0 : index
    %c0_5 = arith.constant 0 : index
    %4 = vector.load %arg3[%c0_4, %c0_5] : memref<1x96xf32, #tpu.memory_space<vmem>>, vector<1x96xf32>
    %5 = vector.broadcast %4 : vector<1x96xf32> to vector<8x96xf32>
    %6 = arith.addf %3, %5 : vector<8x96xf32>
    %7 = vector.extract_strided_slice %6 {offsets = [0, 0], sizes = [8, 32], strides = [1, 1]} : vector<8x96xf32> to vector<8x32xf32>
    %8 = vector.extract_strided_slice %6 {offsets = [0, 32], sizes = [8, 32], strides = [1, 1]} : vector<8x96xf32> to vector<8x32xf32>
    %9 = vector.extract_strided_slice %6 {offsets = [0, 64], sizes = [8, 32], strides = [1, 1]} : vector<8x96xf32> to vector<8x32xf32>
    %10 = vector.extract_strided_slice %7 {offsets = [0, 0], sizes = [8, 8], strides = [1, 1]} : vector<8x32xf32> to vector<8x8xf32>
    %11 = vector.extract_strided_slice %8 {offsets = [0, 0], sizes = [8, 8], strides = [1, 1]} : vector<8x32xf32> to vector<8x8xf32>
    %12 = vector.extract_strided_slice %9 {offsets = [0, 0], sizes = [8, 8], strides = [1, 1]} : vector<8x32xf32> to vector<8x8xf32>
    %13 = tpu.transpose %11, [1, 0] : vector<8x8xf32> -> vector<8x8xf32>
    %cst_6 = arith.constant dense<0.000000e+00> : vector<8x8xf32>
    %14 = tpu.matmul %10, %13, %cst_6 {dimension_numbers = #tpu.dot_dimension_numbers<[1], [0], [0], [1], [0, 0, 1, 1], [], []>} : vector<8x8xf32>, vector<8x8xf32>, vector<8x8xf32> -> vector<8x8xf32>
    %cst_7 = arith.constant dense<0xFF800000> : vector<8xf32>
    %15 = vector.multi_reduction <maximumf>, %14, %cst_7 [1] : vector<8x8xf32> to vector<8xf32>
    %16 = vector.shape_cast %15 : vector<8xf32> to vector<8x1xf32>
    %17 = vector.broadcast %16 : vector<8x1xf32> to vector<8x8xf32>
    %18 = arith.subf %14, %17 : vector<8x8xf32>
    %19 = math.exp %18 : vector<8x8xf32>
    %cst_8 = arith.constant dense<0.000000e+00> : vector<8xf32>
    %20 = vector.multi_reduction <add>, %19, %cst_8 [1] : vector<8x8xf32> to vector<8xf32>
    %21 = vector.shape_cast %20 : vector<8xf32> to vector<8x1xf32>
    %22 = tpu.reciprocal %21 : vector<8x1xf32> -> vector<8x1xf32>
    %23 = vector.broadcast %22 : vector<8x1xf32> to vector<8x8xf32>
    %24 = arith.mulf %19, %23 : vector<8x8xf32>
    %cst_9 = arith.constant dense<0.000000e+00> : vector<8x8xf32>
    %25 = tpu.matmul %24, %12, %cst_9 {dimension_numbers = #tpu.dot_dimension_numbers<[1], [0], [0], [1], [0, 0, 1, 1], [], []>} : vector<8x8xf32>, vector<8x8xf32>, vector<8x8xf32> -> vector<8x8xf32>
    %26 = vector.extract_strided_slice %7 {offsets = [0, 8], sizes = [8, 8], strides = [1, 1]} : vector<8x32xf32> to vector<8x8xf32>
    %27 = vector.extract_strided_slice %8 {offsets = [0, 8], sizes = [8, 8], strides = [1, 1]} : vector<8x32xf32> to vector<8x8xf32>
    %28 = vector.extract_strided_slice %9 {offsets = [0, 8], sizes = [8, 8], strides = [1, 1]} : vector<8x32xf32> to vector<8x8xf32>
    %29 = tpu.transpose %27, [1, 0] : vector<8x8xf32> -> vector<8x8xf32>
    %cst_10 = arith.constant dense<0.000000e+00> : vector<8x8xf32>
    %30 = tpu.matmul %26, %29, %cst_10 {dimension_numbers = #tpu.dot_dimension_numbers<[1], [0], [0], [1], [0, 0, 1, 1], [], []>} : vector<8x8xf32>, vector<8x8xf32>, vector<8x8xf32> -> vector<8x8xf32>
    %cst_11 = arith.constant dense<0xFF800000> : vector<8xf32>
    %31 = vector.multi_reduction <maximumf>, %30, %cst_11 [1] : vector<8x8xf32> to vector<8xf32>
    %32 = vector.shape_cast %31 : vector<8xf32> to vector<8x1xf32>
    %33 = vector.broadcast %32 : vector<8x1xf32> to vector<8x8xf32>
    %34 = arith.subf %30, %33 : vector<8x8xf32>
    %35 = math.exp %34 : vector<8x8xf32>
    %cst_12 = arith.constant dense<0.000000e+00> : vector<8xf32>
    %36 = vector.multi_reduction <add>, %35, %cst_12 [1] : vector<8x8xf32> to vector<8xf32>
    %37 = vector.shape_cast %36 : vector<8xf32> to vector<8x1xf32>
    %38 = tpu.reciprocal %37 : vector<8x1xf32> -> vector<8x1xf32>
    %39 = vector.broadcast %38 : vector<8x1xf32> to vector<8x8xf32>
    %40 = arith.mulf %35, %39 : vector<8x8xf32>
    %cst_13 = arith.constant dense<0.000000e+00> : vector<8x8xf32>
    %41 = tpu.matmul %40, %28, %cst_13 {dimension_numbers = #tpu.dot_dimension_numbers<[1], [0], [0], [1], [0, 0, 1, 1], [], []>} : vector<8x8xf32>, vector<8x8xf32>, vector<8x8xf32> -> vector<8x8xf32>
    %42 = vector.extract_strided_slice %7 {offsets = [0, 16], sizes = [8, 8], strides = [1, 1]} : vector<8x32xf32> to vector<8x8xf32>
    %43 = vector.extract_strided_slice %8 {offsets = [0, 16], sizes = [8, 8], strides = [1, 1]} : vector<8x32xf32> to vector<8x8xf32>
    %44 = vector.extract_strided_slice %9 {offsets = [0, 16], sizes = [8, 8], strides = [1, 1]} : vector<8x32xf32> to vector<8x8xf32>
    %45 = tpu.transpose %43, [1, 0] : vector<8x8xf32> -> vector<8x8xf32>
    %cst_14 = arith.constant dense<0.000000e+00> : vector<8x8xf32>
    %46 = tpu.matmul %42, %45, %cst_14 {dimension_numbers = #tpu.dot_dimension_numbers<[1], [0], [0], [1], [0, 0, 1, 1], [], []>} : vector<8x8xf32>, vector<8x8xf32>, vector<8x8xf32> -> vector<8x8xf32>
    %cst_15 = arith.constant dense<0xFF800000> : vector<8xf32>
    %47 = vector.multi_reduction <maximumf>, %46, %cst_15 [1] : vector<8x8xf32> to vector<8xf32>
    %48 = vector.shape_cast %47 : vector<8xf32> to vector<8x1xf32>
    %49 = vector.broadcast %48 : vector<8x1xf32> to vector<8x8xf32>
    %50 = arith.subf %46, %49 : vector<8x8xf32>
    %51 = math.exp %50 : vector<8x8xf32>
    %cst_16 = arith.constant dense<0.000000e+00> : vector<8xf32>
    %52 = vector.multi_reduction <add>, %51, %cst_16 [1] : vector<8x8xf32> to vector<8xf32>
    %53 = vector.shape_cast %52 : vector<8xf32> to vector<8x1xf32>
    %54 = tpu.reciprocal %53 : vector<8x1xf32> -> vector<8x1xf32>
    %55 = vector.broadcast %54 : vector<8x1xf32> to vector<8x8xf32>
    %56 = arith.mulf %51, %55 : vector<8x8xf32>
    %cst_17 = arith.constant dense<0.000000e+00> : vector<8x8xf32>
    %57 = tpu.matmul %56, %44, %cst_17 {dimension_numbers = #tpu.dot_dimension_numbers<[1], [0], [0], [1], [0, 0, 1, 1], [], []>} : vector<8x8xf32>, vector<8x8xf32>, vector<8x8xf32> -> vector<8x8xf32>
    %58 = vector.extract_strided_slice %7 {offsets = [0, 24], sizes = [8, 8], strides = [1, 1]} : vector<8x32xf32> to vector<8x8xf32>
    %59 = vector.extract_strided_slice %8 {offsets = [0, 24], sizes = [8, 8], strides = [1, 1]} : vector<8x32xf32> to vector<8x8xf32>
    %60 = vector.extract_strided_slice %9 {offsets = [0, 24], sizes = [8, 8], strides = [1, 1]} : vector<8x32xf32> to vector<8x8xf32>
    %61 = tpu.transpose %59, [1, 0] : vector<8x8xf32> -> vector<8x8xf32>
    %cst_18 = arith.constant dense<0.000000e+00> : vector<8x8xf32>
    %62 = tpu.matmul %58, %61, %cst_18 {dimension_numbers = #tpu.dot_dimension_numbers<[1], [0], [0], [1], [0, 0, 1, 1], [], []>} : vector<8x8xf32>, vector<8x8xf32>, vector<8x8xf32> -> vector<8x8xf32>
    %cst_19 = arith.constant dense<0xFF800000> : vector<8xf32>
    %63 = vector.multi_reduction <maximumf>, %62, %cst_19 [1] : vector<8x8xf32> to vector<8xf32>
    %64 = vector.shape_cast %63 : vector<8xf32> to vector<8x1xf32>
    %65 = vector.broadcast %64 : vector<8x1xf32> to vector<8x8xf32>
    %66 = arith.subf %62, %65 : vector<8x8xf32>
    %67 = math.exp %66 : vector<8x8xf32>
    %cst_20 = arith.constant dense<0.000000e+00> : vector<8xf32>
    %68 = vector.multi_reduction <add>, %67, %cst_20 [1] : vector<8x8xf32> to vector<8xf32>
    %69 = vector.shape_cast %68 : vector<8xf32> to vector<8x1xf32>
    %70 = tpu.reciprocal %69 : vector<8x1xf32> -> vector<8x1xf32>
    %71 = vector.broadcast %70 : vector<8x1xf32> to vector<8x8xf32>
    %72 = arith.mulf %67, %71 : vector<8x8xf32>
    %cst_21 = arith.constant dense<0.000000e+00> : vector<8x8xf32>
    %73 = tpu.matmul %72, %60, %cst_21 {dimension_numbers = #tpu.dot_dimension_numbers<[1], [0], [0], [1], [0, 0, 1, 1], [], []>} : vector<8x8xf32>, vector<8x8xf32>, vector<8x8xf32> -> vector<8x8xf32>
    %74 = tpu.concatenate %25, %41, %57, %73 in 1 : vector<8x8xf32>, vector<8x8xf32>, vector<8x8xf32>, vector<8x8xf32> -> vector<8x32xf32>
    %c0_22 = arith.constant 0 : index
    %c0_23 = arith.constant 0 : index
    %c0_24 = arith.constant 0 : index
    %75 = vector.load %arg4[%c0_22, %c0_23, %c0_24] : memref<1x8x32xf32, #tpu.memory_space<vmem>>, vector<1x8x32xf32>
    %76 = vector.shape_cast %75 : vector<1x8x32xf32> to vector<8x32xf32>
    %77 = vector.shape_cast %74 : vector<8x32xf32> to vector<1x8x32xf32>
    tpu.vector_store %arg4[%c0_22, %c0_23, %c0_24], %77 {strides = array<i32>} : memref<1x8x32xf32, #tpu.memory_space<vmem>>, vector<1x8x32xf32>,
    return
  }
  func.func @transform_0(%arg0: i32) -> (i32, i32, i32) {
    %c0_i32 = arith.constant 0 : i32
    %c0_i32_0 = arith.constant 0 : i32
    %c0_i32_1 = arith.constant 0 : i32
    return %arg0, %c0_i32, %c0_i32_0 : i32, i32, i32
  }
  func.func @transform_1(%arg0: i32) -> (i32, i32) {
    %c0_i32 = arith.constant 0 : i32
    %c0_i32_0 = arith.constant 0 : i32
    %c0_i32_1 = arith.constant 0 : i32
    return %c0_i32, %c0_i32_0 : i32, i32
  }
  func.func @transform_2(%arg0: i32) -> (i32, i32) {
    %c0_i32 = arith.constant 0 : i32
    %c0_i32_0 = arith.constant 0 : i32
    %c0_i32_1 = arith.constant 0 : i32
    return %c0_i32, %c0_i32_0 : i32, i32
  }
  func.func @transform_3(%arg0: i32) -> (i32, i32, i32) {
    %c0_i32 = arith.constant 0 : i32
    %c0_i32_0 = arith.constant 0 : i32
    %c0_i32_1 = arith.constant 0 : i32
    return %arg0, %c0_i32, %c0_i32_0 : i32, i32, i32
  }
}

</mosaic_0001>

<bundles_post_ra>
// kernel: tpu_custom_call.1
= control target key start
LH: loop header
LB: loop body
LE: loop exit
PB: predicated region body
PF: predicated region fallthrough
CT: control target
= control target key end

     0   :  { %8 = vsyncpa [#allocation3], 0  ;;  %s1649_s0 = inlined_call_operand.hbm [shape: f32[2,8,32], index: 0, kind: input, shape index: {}]   ;;  %s1650_s1 = inlined_call_operand.hbm [shape: f32[32,96], index: 1, kind: input, shape index: {}]   ;;  %s1651_s2 = inlined_call_operand.vmem [shape: f32[1,96], index: 2, kind: input, shape index: {}]   ;;  %s1652_s3 = inlined_call_operand.hbm [shape: f32[2,8,32], index: 3, kind: output, shape index: {}]  }
   0x1   :  { %10 = vsyncpa [#allocation3 + $0x1], 0 }
   0x2   :  { %11 = vsyncpa [#allocation6], 0 }
   0x3   :  { %12 = vsyncpa [#allocation4], 0 }
   0x4   :  { %14 = vsyncpa [#allocation4 + $0x1], 0  ;;  %s1415_s12 = smov 0   ;;  %s1417_s13 = smov 0  }
   0x5   :  { %s1419_s14 = smov 0   ;;  %s1421_s15 = smov 0  }
   0x6 LB: > { %s1436_s16 = sadd.s32 4294967295, %s1372_s15   ;;  %s1059_s17 = sadd.s32 4294967294, %s1372_s15   ;;  %s1372_s15 = sphi %s1421_s15, %s1674_s15   ;;  %s1368_s14 = sphi %s1419_s14, %s1673_s14   ;;  %s1364_s13 = sphi %s1417_s13, %s1672_s13   ;;  %s1360_s12 = sphi %s1415_s12, %s1671_s12  }
   0x7   : > { %p40_p0 = scmp.ne.s32.totalorder %s1364_s13, %s1360_s12  ;;  %p1653_p1 = scmp.eq.s32.totalorder %s1436_s16, 0 }
   0x8   : > { %p112_p3 = scmp.eq.s32.totalorder %s1059_s17, 1  ;;  %p1060_p5 = scmp.ge.s32.totalorder %s1372_s15, 1 }
   0x9   : > { %p1445_p4 = por %p1653_p1, %p40_p0  ;;  %p119_p7 = scmp.lt.s32.totalorder %s1372_s15, 3 }
   0xa   : > { %p1450_p6 = por %p112_p3, %p40_p0  ;;  %s1374_s21 = smov [#allocation5]  }
   0xb   : > { %s1657_s18 = scalar_select %p1445_p4, 1, 0 }
   0xc   : > { %s1658_s19 = scalar_select %p1450_p6, 1, 0 }
   0xd   : > { %p1455_p8 = pnand %p1060_p5, %p119_p7  ;;  %s131_s22 = sshll.u32 %s1374_s21, 4  ;;  %s132_s22 = int_to_ptr.vmem [resolvable:$true] %s131_s22 }
   0xe   : > { %s1469_s24 = sadd.s32 1, %s1372_s15   ;;  %s27_s25 = sadd.s32 1, %s1368_s14 }
   0xf   : > { %s1659_s20 = scalar_select %p1455_p8, 1, 0 }
  0x10   : > { %p1167_p9 = pneg %p1455_p8  ;;  %s24_s26 = ssub.s32 %s1372_s15, %s1469_s24 }
  0x11   : > { %s1261_s27 = scalar_lea.vmem %s132_s22, 512  ;;  %p1269_p5 = scmp.lt.s32.totalorder %s132_s22, %s132_s22 }
  0x12   : > { %p1464_p11 = pnand %p1167_p9, %p1653_p1  ;;  %p1262_p13 = scmp.ne.s32.totalorder %s132_s22, %s1261_s27 }
  0x13   : > { %p1270_p7 = scmp.lt.s32.totalorder %s1261_s27, %s1261_s27 }
  0x14   : > { %p1252_p12 = pneg %p1464_p11 }
  0x15   : > { %p1271_p10 = por %p1270_p7, %p1269_p5 }
  0x16   : > { %p1264_p0 = pnand %p1262_p13, %p1252_p12 }
  0x18   : > { %p1265_p3 = pneg %p1264_p0 }
  0x1a   : > { %p1272_p2 = pnand %p1271_p10, %p1265_p3 }
  0x1c   : > { %1275 = shalt.err (!%p1272_p2)
}
  0x1d   : > { %s1375_s28 = smov 128   ;;  %s1376_s29 = smov 8  }
  0x1e   : > { %1170 = dma.hbm_to_vmem [thread:$0]  (!%p1464_p11), %s1650_s1, 512, %s132_s22, [#allocation6], %s1375_s28, %s1375_s28, %s1376_s29  }
  0x1f   : > { %p25_p9 = scmp.eq.s32.totalorder %s24_s26, 0  ;;  %p34_p12 = scmp.ne.s32.totalorder %s1368_s14, %s1364_s13 }
  0x20   : > { %p35_p10 = scmp.eq.s32.totalorder %s1372_s15, 0  ;;  %p1180_p2 = scmp.lt.s32.totalorder %s1372_s15, 2 }
  0x21   : > { %s1486_s5 = scalar_select %p25_p9, %s1368_s14, %s27_s25  }
  0x22   : > { %p36_p13 = por %p35_p10, %p34_p12  ;;  %p1661_p0 = scmp.eq.s32.totalorder %s1436_s16, 1 }
  0x23   : > { %s148_s7 = sand.u32 1, %s1368_s14   ;;  %s1064_s8 = sshll.u32 %s1372_s15, 7 }
  0x24   : > { %p1490_p3 = por %p1661_p0, %p34_p12  ;;  %s1063_s9 = sshll.u32 %s148_s7, 3 }
  0x25   : > { %s1499_s17 = scalar_lea.hbm %s1649_s0, %s1064_s8  ;;  %s152_s21 = scalar_lea.vmem [#allocation2], %s1063_s9 }
  0x26   : > { %s1662_s6 = scalar_select %p1490_p3, 1, 0 }
  0x27   : > { %s159_s22 = sshll.u32 %s152_s21, 4  ;;  %p1501_p11 = pnand %p1180_p2, %p36_p13  ;;  %s160_s22 = int_to_ptr.vmem [resolvable:$true] %s159_s22 }
  0x28   : > { %s149_s25 = scalar_lea.sflag [#allocation3], %s148_s7  ;;  %s1276_s26 = scalar_lea.hbm %s1499_s17, 128 }
  0x29   : > { %p1277_p5 = scmp.ne.s32.totalorder %s1499_s17, %s1276_s26  ;;  %p1278_p7 = pneg %p1501_p11 }
  0x2a   : > { %s1281_s29 = scalar_lea.hbm %s1649_s0, 256  ;;  %p1282_p10 = scmp.lt.s32.totalorder %s1499_s17, %s1649_s0 }
  0x2b   : > { %p1279_p9 = pnand %p1278_p7, %p1277_p5  ;;  %p1283_p2 = scmp.lt.s32.totalorder %s1281_s29, %s1276_s26 }
  0x2d   : > { %p1280_p12 = pneg %p1279_p9  ;;  %p1284_p13 = por %p1283_p2, %p1282_p10 }
  0x2f   : > { %p1285_p0 = pnand %p1284_p13, %p1280_p12 }
  0x31   : > { %1288 = shalt.err (!%p1285_p0)
}
  0x32   : > { %s1289_s8 = scalar_lea.vmem %s160_s22, 128  ;;  %s1377_s7 = smov [#allocation2]  }
  0x33   : > { %p1290_p1 = scmp.ne.s32.totalorder %s160_s22, %s1289_s8  ;;  %s1294_s9 = sshll.u32 %s1377_s7, 4  ;;  %s1295_s9 = int_to_ptr.vmem [resolvable:$false] %s1294_s9 }
  0x34   : > { %s1296_s10 = scalar_lea.vmem %s1295_s9, 256  ;;  %p1297_p5 = scmp.lt.s32.totalorder %s160_s22, %s1295_s9 }
  0x35   : > { %p1292_p6 = pnand %p1290_p1, %p1278_p7  ;;  %p1298_p9 = scmp.lt.s32.totalorder %s1296_s10, %s1289_s8 }
  0x37   : > { %p1293_p3 = pneg %p1292_p6  ;;  %p1299_p4 = por %p1298_p9, %p1297_p5 }
  0x39   : > { %p1300_p8 = pnand %p1299_p4, %p1293_p3 }
  0x3b   : > { %1303 = shalt.err (!%p1300_p8)
}
  0x3c   : > { %1174 = dma.hbm_to_vmem [thread:$0]  (!%p1501_p11), %s1499_s17, 128, %s160_s22, %s149_s25  }
  0x3d   : > { %p1664_p12 = scmp.ne.s32.totalorder %s1659_s20, 0 }
  0x3e   : > { %s1522_s11 = sand.u32 (!%p1664_p12), 1, %s1364_s13   ;;  %p1665_p1 = scmp.ne.s32.totalorder (!%p1664_p12), %s1657_s18, 0 }
  0x3f   : > { %168 = sbr.rel (%p1664_p12) target bundleno = 1279 (0x4ff), region = 32  ;;  %s1066_s21 = sshll.u32 (!%p1664_p12), %s1522_s11, 3 }
  0x40   : > { %s171_s26 = scalar_lea.sflag (!%p1664_p12), [#allocation3], %s1522_s11  ;;  %s174_s27 = scalar_lea.vmem (!%p1664_p12), [#allocation2], %s1066_s21 }
  0x44   : > { %1347 = dma.done.wait (%p1665_p1), %s171_s26, 128  }
  0x45   : > { %1349 = vsyncadd (%p1665_p1), %s171_s26, 4294967168  ;;  %p1666_p4 = scmp.eq.s32.totalorder %s1436_s16, 0 }
  0x47   : > { %1351 = dma.done.wait (%p1666_p4), [#allocation6], 512   ;;  %p1667_p6 = pmov %p1666_p4 }
  0x48   : > { %v1378_v0 = vmov 0.0   ;;  %vm1379_vm0 = vmmov 0   ;;  %v205_v1 = vld [vmem:[#allocation5 + $0x18] sm:$0xff]  ;;  %v204_v2 = vld [vmem:[#allocation5 + $0x10] sm:$0xff]  ;;  %v203_v3 = vld [vmem:[#allocation5 + $0x8] sm:$0xff]  ;;  %vm213_vm1 = vcmask 261120  }
  0x49   : > { %1353 = vsyncadd (%p1667_p6), [#allocation6], 4294966784  ;;  %1108 = vmatprep.subr.mxu0 %v1378_v0  ;;  %1116 = vmatprep.mubr.msk.f32.mxu0 %vm1379_vm0, %v1378_v0  ;;  %v202_v4 = vld [vmem:[#allocation5] sm:$0xff]  ;;  %v201_v5 = vld [vmem:[%s174_s27] sm:$0xff]  ;;  %s1380_s17 = smov 120   ;;  %s1381_s22 = smov 96  }
  0x4a   : > { %1119 = vmatprep.subr.mxu1 %v1378_v0  ;;  %1121 = vmatprep.mubr.msk.f32.mxu1 %vm1379_vm0, %v1378_v0  ;;  %v1069_v6 = vld [vmem:[%s1651_s2] ss:$0 sm:$0xff]  ;;  %s1382_s23 = smov 80   ;;  %s1383_s25 = smov 88   ;;  %vm290_vm2 = vcmask 64512   ;;  %vm960_vm3 = vcmask 130048  }
  0x4b   : > { %1109 = vmatpush3.msra.mxu0 %v205_v1  ;;  %s1384_s28 = smov 72   ;;  %s1385_s29 = smov 112   ;;  %vm962_vm4 = vcmask 195584  }
  0x4c   : > { %1110 = vmatprep.subr.mxu0 %v1378_v0  ;;  %s1386_s30 = smov 104   ;;  %s1387_s4 = smov 56  }
  0x4d   : > { %1111 = vmatpush3.msra.mxu0 %v204_v2  ;;  %s1388_s8 = smov 64   ;;  %s1389_s7 = smov 48  }
  0x4e   : > { %1112 = vmatprep.subr.mxu0 %v1378_v0  ;;  %s1390_s9 = smov 40   ;;  %s1391_s10 = smov 8  }
  0x4f   : > { %1113 = vmatpush3.msra.mxu0 %v203_v3  ;;  %s1392_s26 = smov 16   ;;  %s1393_s27 = smov 24  }
  0x50   : > { %1114 = vmatprep.subr.mxu0 %v1378_v0  ;;  %s1084_s18 = sshll.u32 %s1436_s16, 7  ;;  %s200_s20 = scalar_lea.vmem [#allocation7], %s1066_s21 }
  0x51   : > { %1115 = vmatpush3.msra.mxu0 %v202_v4  ;;  %p1668_p3 = scmp.ne.s32.totalorder %s1662_s6, 0  ;;  %s1394_s16 = smov [#allocation7]  }
  0x52   : > { %1117 = vmatmul.mubr.msk.f32.vlgmr.msra.gmra.mxu0 %vm213_vm1, %v201_v5  ;;  %1129 = vmatprep.subr.mxu0 %v1378_v0  ;;  %s1308_s21 = sshll.u32 %s1394_s16, 4  ;;  %s1309_s21 = int_to_ptr.vmem [resolvable:$false] %s1308_s21 }
  0x53   : > { %1131 = vmatprep.mubr.msk.f32.mxu0 %vm1379_vm0, %v1378_v0 }
 0x112   : > { %v283_v7 = vpop.f32.mrf.mxu0 }
 0x113   : > { %v1552_v8 = vadd.f32 %v1069_v6, %v283_v7 }
 0x114   : > { %v1118_v9 = vpop.f32.mrf.mxu0 }
 0x115   : > { %452 = vrot.lane.b32.xlu1 %v1552_v8, %s1380_s17  ;;  %288 = vrot.lane.b32.xlu0 %v1552_v8, %s1381_s22  ;;  %s979_s17 = sshll.u32 %s200_s20, 4  ;;  %s980_s17 = int_to_ptr.vmem [resolvable:$true] %s979_s17 }
 0x116   : > { %p1311_p10 = scmp.lt.s32.totalorder %s980_s17, %s1309_s21 }
 0x119   : > { %619 = vrot.lane.b32.xlu1 %v1552_v8, %s1382_s23  ;;  %454 = vrot.lane.b32.xlu0 %v1552_v8, %s1383_s25  ;;  %s1611_s25 = scalar_lea.hbm %s1652_s3, %s1084_s18 }
 0x11d   : > { %784 = vrot.lane.b32.xlu1 %v1552_v8, %s1384_s28  ;;  %617 = vrot.lane.b32.xlu0 %v1552_v8, %s1385_s29  ;;  %s966_s28 = scalar_lea.sflag [#allocation4], %s1522_s11  ;;  %s1304_s29 = scalar_lea.vmem %s980_s17, 128 }
 0x11e   : > { %p1305_p8 = scmp.ne.s32.totalorder %s980_s17, %s1304_s29 }
 0x120   : > { %p1306_p11 = pnand %p1305_p8, %p1668_p3 }
 0x121   : > { %782 = vrot.lane.b32.xlu0 %v1552_v8, %s1386_s30  ;;  %s1310_s30 = scalar_lea.vmem %s1309_s21, 256 }
 0x122   : > { %p1307_p7 = pneg %p1306_p11  ;;  %p1312_p2 = scmp.lt.s32.totalorder %s1310_s30, %s1304_s29 }
 0x124   : > { %p1313_p13 = por %p1312_p2, %p1311_p10 }
 0x126   : > { %p1314_p0 = pnand %p1313_p13, %p1307_p7 }
 0x187   : > { %v453_v10 = vpop.permute.xlu1 %452  ;;  %v289_v11 = vpop.permute.xlu0 %288 }
 0x188   : > { %1120 = vmatpush3.xpose.msk.msra.mxu1 %vm290_vm2, %v289_v11 }
 0x189   : > { %1124 = vmatprep.subr.mxu1 %v1378_v0 }
 0x18b   : > { %1122 = vmatmul.mubr.msk.f32.vlgmr.msra.gmra.mxu1 %vm290_vm2, %v1552_v8  ;;  %v455_v12 = vpop.permute.xlu0 %454  ;;  %v620_v13 = vpop.permute.xlu1 %619 }
 0x18c   : > { %1130 = vmatpush3.xpose.msk.msra.mxu0 %vm290_vm2, %v455_v12  ;;  %1126 = vmatprep.mubr.msk.f32.mxu1 %vm1379_vm0, %v1378_v0 }
 0x18d   : > { %1139 = vmatprep.subr.mxu0 %v1378_v0 }
 0x18f   : > { %1132 = vmatmul.mubr.msk.f32.vlgmr.msra.gmra.mxu0 %vm290_vm2, %v453_v10  ;;  %v618_v14 = vpop.permute.xlu0 %617  ;;  %v785_v15 = vpop.permute.xlu1 %784 }
 0x190   : > { %1140 = vmatpush3.xpose.msk.msra.mxu0 %vm290_vm2, %v620_v13  ;;  %1141 = vmatprep.mubr.msk.f32.mxu0 %vm1379_vm0, %v1378_v0 }
 0x191   : > { %1149 = vmatprep.subr.mxu0 %v1378_v0 }
 0x193   : > { %1142 = vmatmul.mubr.msk.f32.vlgmr.msra.gmra.mxu0 %vm290_vm2, %v618_v14  ;;  %v783_v16 = vpop.permute.xlu0 %782 }
 0x194   : > { %1150 = vmatpush3.xpose.msk.msra.mxu0 %vm290_vm2, %v785_v15  ;;  %1151 = vmatprep.mubr.msk.f32.mxu0 %vm1379_vm0, %v1378_v0 }
 0x197   : > { %1152 = vmatmul.mubr.msk.f32.vlgmr.msra.gmra.mxu0 %vm290_vm2, %v783_v16 }
 0x24b   : > { %v361_v17 = vpop.f32.mrf.mxu1 }
 0x24c   : > { %v365_v18 = vsel %vm290_vm2, %v361_v17, -inf }
 0x24d   : > { %366 = vmax.xlane.f32.xlu1 %v365_v18  ;;  %v1123_v19 = vpop.f32.mrf.mxu1 }
 0x24f   : > { %v526_v20 = vpop.f32.mrf.mxu0 }
 0x250   : > { %v530_v21 = vsel %vm290_vm2, %v526_v20, -inf }
 0x251   : > { %531 = vmax.xlane.f32.xlu0 %v530_v21  ;;  %v1133_v22 = vpop.f32.mrf.mxu0 }
 0x253   : > { %v691_v23 = vpop.f32.mrf.mxu0 }
 0x254   : > { %v695_v24 = vsel %vm290_vm2, %v691_v23, -inf }
 0x255   : > { %696 = vmax.xlane.f32.xlu0 %v695_v24  ;;  %v1143_v25 = vpop.f32.mrf.mxu0 }
 0x257   : > { %v856_v26 = vpop.f32.mrf.mxu0 }
 0x258   : > { %v860_v27 = vsel %vm290_vm2, %v856_v26, -inf }
 0x259   : > { %861 = vmax.xlane.f32.xlu1 %v860_v27  ;;  %v1153_v28 = vpop.f32.mrf.mxu0 }
 0x26a   : > { %541 = vrot.lane.b32.xlu1 %v1552_v8, %s1387_s4 }
 0x2d6   : > { %v367_v29 = vpop.xlane.xlu1 %366 }
 0x2d7   : > { %v368_v30 = vsub.f32 %v361_v17, %v367_v29 }
 0x2d9   : > { %v369_v31 = vmul.f32 1.442695, %v368_v30 }
 0x2da   : > { %v532_v32 = vpop.xlane.xlu0 %531 }
 0x2db   : > { %1234 = vpow2.f32 %v369_v31  ;;  %v533_v33 = vsub.f32 %v526_v20, %v532_v32 }
 0x2dd   : > { %v534_v34 = vmul.f32 1.442695, %v533_v33 }
 0x2de   : > { %v697_v44 = vpop.xlane.xlu0 %696 }
 0x2df   : > { %1236 = vpow2.f32 %v534_v34  ;;  %v698_v45 = vsub.f32 %v691_v23, %v697_v44 }
 0x2e1   : > { %v699_v46 = vmul.f32 1.442695, %v698_v45 }
 0x2e2   : > { %v862_v35 = vpop.xlane.xlu1 %861 }
 0x2e3   : > { %v863_v36 = vsub.f32 %v856_v26, %v862_v35 }
 0x2e5   : > { %v864_v37 = vmul.f32 1.442695, %v863_v36 }
 0x2e6   : > { %v542_v49 = vpop.permute.xlu1 %541 }
 0x2e7   : > { %1238 = vpow2.f32 %v864_v37 }
 0x2e8   : > { %v1235_v38 = vpop.eup %1234  ;;  %1240 = vpow2.f32 %v699_v46 }
 0x2e9   : > { %v371_v39 = vsel %vm290_vm2, %v1235_v38, 0.0 }
 0x2ea   : > { %372 = vadd.xlane.f32.xlu0 %v371_v39 }
 0x2ec   : > { %v1237_v40 = vpop.eup %1236 }
 0x2ed   : > { %v536_v41 = vsel %vm290_vm2, %v1237_v40, 0.0 }
 0x2ee   : > { %537 = vadd.xlane.f32.xlu1 %v536_v41 }
 0x2f4   : > { %v1239_v42 = vpop.eup %1238 }
 0x2f5   : > { %v866_v43 = vsel %vm290_vm2, %v1239_v42, 0.0  ;;  %v1241_v47 = vpop.eup %1240 }
 0x2f6   : > { %867 = vadd.xlane.f32.xlu1 %v866_v43  ;;  %v701_v48 = vsel %vm290_vm2, %v1241_v47, 0.0 }
 0x300   : > { %376 = vrot.lane.b32.xlu0 %v1552_v8, %s1388_s8 }
 0x307   : > { %706 = vrot.lane.b32.xlu1 %v1552_v8, %s1389_s7 }
 0x31f   : > { %702 = vadd.xlane.f32.xlu0 %v701_v48 }
 0x335   : > { %871 = vrot.lane.b32.xlu0 %v1552_v8, %s1390_s9 }
 0x373   : > { %v373_v50 = vpop.xlane.xlu0 %372 }
 0x374   : > { %1242 = vrcp.f32 %v373_v50 }
 0x377   : > { %v377_v51 = vpop.permute.xlu0 %376  ;;  %v538_v52 = vpop.xlane.xlu1 %537 }
 0x378   : > { %1244 = vrcp.f32 %v538_v52  ;;  %1125 = vmatpush3.msra.mxu1 %v377_v51 }
 0x379   : > { %1134 = vmatprep.subr.mxu1 %v1378_v0 }
 0x37f   : > { %v868_v54 = vpop.xlane.xlu1 %867 }
 0x381   : > { %v1243_v53 = vpop.eup %1242 }
 0x382   : > { %v375_v55 = vmul.f32 %v1243_v53, %v1235_v38 }
 0x383   : > { %v707_v58 = vpop.permute.xlu1 %706 }
 0x384   : > { %1127 = vmatmul.mubr.msk.f32.vlgmr.msra.gmra.mxu1 %vm290_vm2, %v375_v55 }
 0x385   : > { %v1245_v56 = vpop.eup %1244  ;;  %1135 = vmatpush3.msra.mxu1 %v542_v49  ;;  %1136 = vmatprep.mubr.msk.f32.mxu1 %vm1379_vm0, %v1378_v0 }
 0x386   : > { %1144 = vmatprep.subr.mxu1 %v1378_v0  ;;  %v540_v57 = vmul.f32 %v1245_v56, %v1237_v40 }
 0x388   : > { %1137 = vmatmul.mubr.msk.f32.vlgmr.msra.gmra.mxu1 %vm290_vm2, %v540_v57 }
 0x389   : > { %1145 = vmatpush3.msra.mxu1 %v707_v58  ;;  %1146 = vmatprep.mubr.msk.f32.mxu1 %vm1379_vm0, %v1378_v0 }
 0x38a   : > { %1154 = vmatprep.subr.mxu1 %v1378_v0 }
 0x3a8   : > { %v703_v59 = vpop.xlane.xlu0 %702 }
 0x3a9   : > { %1246 = vrcp.f32 %v703_v59 }
 0x3aa   : > { %1248 = vrcp.f32 %v868_v54 }
 0x3ac   : > { %v872_v63 = vpop.permute.xlu0 %871 }
 0x3b6   : > { %v1247_v60 = vpop.eup %1246 }
 0x3b7   : > { %v705_v61 = vmul.f32 %v1247_v60, %v1241_v47  ;;  %v1249_v62 = vpop.eup %1248 }
 0x3b8   : > { %v870_v1 = vmul.f32 %v1249_v62, %v1239_v42 }
 0x3b9   : > { %1147 = vmatmul.mubr.msk.f32.vlgmr.msra.gmra.mxu1 %vm290_vm2, %v705_v61 }
 0x3ba   : > { %1155 = vmatpush3.msra.mxu1 %v872_v63  ;;  %1156 = vmatprep.mubr.msk.f32.mxu1 %vm1379_vm0, %v1378_v0 }
 0x3bd   : > { %1157 = vmatmul.mubr.msk.f32.vlgmr.msra.gmra.mxu1 %vm290_vm2, %v870_v1 }
 0x444   : > { %v448_v2 = vpop.f32.mrf.mxu1 }
 0x446   : > { %v1128_v3 = vpop.f32.mrf.mxu1 }
 0x448   : > { %v613_v4 = vpop.f32.mrf.mxu1 }
 0x449   : > { %948 = vrot.lane.b32.xlu1 %v613_v4, %s1391_s10 }
 0x44a   : > { %v1138_v5 = vpop.f32.mrf.mxu1 }
 0x479   : > { %v778_v6 = vpop.f32.mrf.mxu1 }
 0x47a   : > { %952 = vrot.lane.b32.xlu0 %v778_v6, %s1392_s26 }
 0x47b   : > { %v1148_v7 = vpop.f32.mrf.mxu1 }
 0x47d   : > { %v943_v8 = vpop.f32.mrf.mxu1 }
 0x47e   : > { %956 = vrot.lane.b32.xlu1 %v943_v8, %s1393_s27 }
 0x47f   : > { %v1158_v0 = vpop.f32.mrf.mxu1 }
 0x4bb   : > { %v949_v9 = vpop.permute.xlu1 %948 }
 0x4bc   : > { %v959_v11 = vsel %vm290_vm2, %v448_v2, %v949_v9 }
 0x4ec   : > { %v953_v10 = vpop.permute.xlu0 %952 }
 0x4ed   : > { %v961_v12 = vsel %vm960_vm3, %v959_v11, %v953_v10 }
 0x4f0   : > { %v957_v13 = vpop.permute.xlu1 %956 }
 0x4f1   : > { %v963_v14 = vsel %vm962_vm4, %v961_v12, %v957_v13 }
 0x4f2   : > { %964 = vst.msk [vmem:[%s200_s20] sm:$0xff] %vm213_vm1, %v963_v14 }
 0x4f3   : > { %1317 = shalt.err (!%p1314_p0)
}
 0x4f4   : > { %s1318_s4 = scalar_lea.hbm %s1611_s25, 128  ;;  %s1322_s7 = scalar_lea.hbm %s1652_s3, 256 }
 0x4f5   : > { %p1319_p5 = scmp.ne.s32.totalorder %s1611_s25, %s1318_s4  ;;  %p1323_p1 = scmp.lt.s32.totalorder %s1611_s25, %s1652_s3 }
 0x4f6   : > { %p1324_p4 = scmp.lt.s32.totalorder %s1322_s7, %s1318_s4 }
 0x4f7   : > { %p1320_p9 = pnand %p1319_p5, %p1668_p3 }
 0x4f8   : > { %p1325_p6 = por %p1324_p4, %p1323_p1 }
 0x4f9   : > { %p1321_p12 = pneg %p1320_p9 }
 0x4fb   : > { %p1326_p8 = pnand %p1325_p6, %p1321_p12 }
 0x4fd   : > { %1329 = shalt.err (!%p1326_p8)
}
 0x4fe   : > { %1165 = dma.vmem_to_hbm [thread:$0]  (%p1668_p3), %s980_s17, 128, %s1611_s25, %s966_s28  }
 0x4ff PF: > { %s991_s26 = sand.u32 1, %s1360_s12   ;;  %p1669_p11 = scmp.ne.s32.totalorder %s1658_s19, 0 }
 0x500   : > { %p1670_p7 = scmp.ge.s32.totalorder %s1372_s15, 2  ;;  %s992_s27 = scalar_lea.sflag [#allocation4], %s991_s26 }
 0x502   : > { %p1176_p10 = pnand %p1670_p7, %p1669_p11 }
 0x504   : > { %p1177_p2 = pneg %p1176_p10 }
 0x506   : > { %1355 = dma.done.wait (%p1177_p2), %s992_s27, 128  }
 0x507   : > { %1357 = vsyncadd (%p1177_p2), %s992_s27, 4294967168  ;;  %p17_p13 = scmp.ge.s32.totalorder %s1469_s24, 4   ;;  %s1671_s12 = smov %s1364_s13 }
 0x508   : > { %s1672_s13 = smov %s1368_s14  ;;  %s1673_s14 = smov %s1486_s5 }
 0x509   : > { %s1674_s15 = smov %s1469_s24  ;;  %19 = sbr.rel (!%p17_p13) target bundleno = 6 (0x6), region = 81 }
 0x50e   :  { %997 = vsyncpa [#allocation3], 1 }
 0x50f   :  { %999 = vsyncpa [#allocation3 + $0x1], 1 }
 0x510   :  { %1000 = vsyncpa [#allocation6], 1 }
 0x511   :  { %1001 = vsyncpa [#allocation4], 1 }
 0x512   :  { %1003 = vsyncpa [#allocation4 + $0x1], 1 }

</bundles_post_ra>
